<compile_context>
chip_gen: v7x
topology: tpu7x:2x2x1
jax: 0.10.0
libtpu: 0.0.40
codegen_flags: <defaults>
</compile_context>

<pallas_src>
import functools
import math

import jax
import jax.numpy as jnp
from jax.experimental import pallas as pl
from jax.experimental.pallas import tpu as pltpu


def _round_up(v, m):
    return ((v + m - 1) // m) * m


# --------------------------------------------------------------------------
# Stage 1: support = x @ weight   (computed once; bf16 compute, bf16 output)
# --------------------------------------------------------------------------
def _support_kernel(x_ref, w_ref, out_ref):
    out_ref[...] = jnp.dot(
        x_ref[...].astype(jnp.bfloat16),
        w_ref[...].astype(jnp.bfloat16),
        preferred_element_type=jnp.float32,
    ).astype(out_ref.dtype)


# --------------------------------------------------------------------------
# Stage 2: output = adj @ support
#   * adj tile upcast to bf16 in-kernel (adj values {0,1,2} are exact)
#   * f32 accumulation directly into the k-resident output block
#   * support either fully VMEM-resident (sliced by k in-kernel) or streamed
# --------------------------------------------------------------------------
def _aggregate_kernel(adj_ref, sup_ref, out_ref, *, tile_k, support_resident):
    k = pl.program_id(1)

    @pl.when(k == 0)
    def _():
        out_ref[...] = jnp.zeros_like(out_ref)

    if support_resident:
        start = pl.multiple_of(k * tile_k, tile_k)
        sup = sup_ref[pl.ds(start, tile_k), :]
    else:
        sup = sup_ref[...]

    out_ref[...] += jnp.dot(
        adj_ref[...].astype(jnp.bfloat16),
        sup,
        preferred_element_type=jnp.float32,
    )


def subgraph_convolution(x, weight, adj, *, tile_n=512, tile_k=512):
    """output = adj @ (x @ weight) with two Pallas TPU kernels."""
    n, in_f = x.shape
    in_f2, out_f = weight.shape
    assert in_f == in_f2
    assert adj.shape == (n, n)

    # Lane-dense output: pad out_features up to a multiple of 128.
    out_f_p = _round_up(out_f, 128)

    # ---------------- tile selection ----------------
    # K tile is the lane dim of the adj block -> multiple of 128.
    tile_k = max(128, min(tile_k, _round_up(n, 128)))
    # Row tile is a sublane dim -> multiple of 8.  Keep >= 2 row tiles so the
    # "parallel" axis can shard across both v7x TensorCores (harmless on
    # single-TC v5e/v6e).
    tile_n = max(8, min(tile_n, _round_up(n, 8)))
    tile_n = min(tile_n, max(8, _round_up(-(-n // 2), 8)))

    adj_itemsize = jnp.dtype(adj.dtype).itemsize
    n_k_p = _round_up(n, tile_k)
    sup_bytes = n_k_p * out_f_p * 2  # bf16 support

    # Support residency decision (conservative double-buffered footprint),
    # gated so it fits v7x's 64 MiB-per-TC VMEM with headroom.
    resident_foot = (2 * sup_bytes
                     + 2 * tile_n * tile_k * adj_itemsize
                     + 2 * tile_n * out_f_p * 4)
    support_resident = resident_foot <= (40 << 20)
    if not support_resident and n >= 2048:
        # Streamed-support fallback: bigger row tile keeps the support
        # re-stream ratio small (out_f_p / tile_n).
        tile_n = min(1024, max(tile_n, _round_up(n // 2, 8)))
    n_rows_p = _round_up(n, tile_n)

    # ---------------- zero padding (exact) ----------------
    x_p = x if n_k_p == n else jnp.pad(x, ((0, n_k_p - n), (0, 0)))
    w_p = (weight if out_f_p == out_f
           else jnp.pad(weight, ((0, 0), (0, out_f_p - out_f))))
    adj_p = (adj if (n_rows_p, n_k_p) == (n, n)
             else jnp.pad(adj, ((0, n_rows_p - n), (0, n_k_p - n))))

    # ---------------- Stage 1: support = x @ weight ----------------
    tile_m = tile_k  # divides n_k_p by construction
    support = pl.pallas_call(
        _support_kernel,
        out_shape=jax.ShapeDtypeStruct((n_k_p, out_f_p), jnp.bfloat16),
        grid_spec=pltpu.PrefetchScalarGridSpec(
            num_scalar_prefetch=0,
            grid=(n_k_p // tile_m,),
            in_specs=[
                pl.BlockSpec((tile_m, in_f), lambda i: (i, 0)),
                # constant index_map -> weight DMA'd once
                pl.BlockSpec((in_f, out_f_p), lambda i: (0, 0)),
            ],
            out_specs=pl.BlockSpec((tile_m, out_f_p), lambda i: (i, 0)),
        ),
        compiler_params=pltpu.CompilerParams(
            dimension_semantics=("parallel",),
        ),
    )(x_p, w_p)

    # ---------------- Stage 2: output = adj @ support ----------------
    if support_resident:
        sup_spec = pl.BlockSpec((n_k_p, out_f_p), lambda i, k: (0, 0))
        sup_vmem = 2 * sup_bytes
    else:
        sup_spec = pl.BlockSpec((tile_k, out_f_p), lambda i, k: (k, 0))
        sup_vmem = 2 * tile_k * out_f_p * 2

    vmem_bytes = (2 * tile_n * tile_k * adj_itemsize
                  + 2 * tile_n * out_f_p * 4
                  + sup_vmem)
    vmem_limit = min(max(int(vmem_bytes * 1.25) + (4 << 20), 32 << 20),
                     56 << 20)

    agg_kernel = functools.partial(
        _aggregate_kernel, tile_k=tile_k, support_resident=support_resident)

    out_p = pl.pallas_call(
        agg_kernel,
        out_shape=jax.ShapeDtypeStruct((n_rows_p, out_f_p), jnp.float32),
        grid_spec=pltpu.PrefetchScalarGridSpec(
            num_scalar_prefetch=0,
            grid=(n_rows_p // tile_n, n_k_p // tile_k),  # reduction axis last
            in_specs=[
                pl.BlockSpec((tile_n, tile_k), lambda i, k: (i, k)),
                sup_spec,
            ],
            out_specs=pl.BlockSpec((tile_n, out_f_p), lambda i, k: (i, 0)),
        ),
        compiler_params=pltpu.CompilerParams(
            dimension_semantics=("parallel", "arbitrary"),
            vmem_limit_bytes=vmem_limit,
        ),
    )(adj_p, support)

    if (n_rows_p, out_f_p) != (n, out_f):
        out_p = out_p[:n, :out_f]
    return out_p


if __name__ == "__main__":
    N = 512
    IN_FEATURES = 64
    OUT_FEATURES = 64   # padded to 128 lanes inside the wrapper

    key = jax.random.PRNGKey(0)
    k_x, k_adj, k_w = jax.random.split(key, 3)

    x = jax.random.normal(k_x, (N, IN_FEATURES), dtype=jnp.float32)

    # Adjacency stored persistently as int8 (values {0,1,2}, exact); the
    # kernel upcasts each tile to bf16 on-chip.  torch.spmm(adj, support)
    # has dense-matmul semantics, so a dense matrix is used here.
    adj_i8 = ((jax.random.uniform(k_adj, (N, N)) < 0.1).astype(jnp.int8)
              + jnp.eye(N, dtype=jnp.int8))

    # reset_parameters(): stdv = 1/sqrt(out_features); weight ~ U(-stdv, stdv)
    stdv = 1.0 / math.sqrt(OUT_FEATURES)
    weight = jax.random.uniform(
        k_w, (IN_FEATURES, OUT_FEATURES), minval=-stdv, maxval=stdv,
        dtype=jnp.float32)

    out = jax.block_until_ready(subgraph_convolution(x, weight, adj_i8))
    assert out.shape == (N, OUT_FEATURES)

    adj_f32 = adj_i8.astype(jnp.float32)

    # Tight check against a precision-matched reference (bf16 support path;
    # adj values are exact in bf16, so only f32 summation order differs).
    sup_bf16 = jnp.dot(x.astype(jnp.bfloat16), weight.astype(jnp.bfloat16),
                       preferred_element_type=jnp.float32).astype(jnp.bfloat16)
    ref_tight = jnp.dot(adj_f32, sup_bf16.astype(jnp.float32),
                        precision=jax.lax.Precision.HIGHEST)
    assert jnp.allclose(out, ref_tight, atol=1e-3, rtol=1e-3), (
        float(jnp.max(jnp.abs(out - ref_tight))))

    # Loose check against the full-f32 PyTorch-equivalent reference (the only
    # deviation is bf16 rounding of x/weight/support).
    ref = jnp.dot(adj_f32,
                  jnp.dot(x, weight, precision=jax.lax.Precision.HIGHEST),
                  precision=jax.lax.Precision.HIGHEST)
    assert jnp.allclose(out, ref, atol=1.5e-1, rtol=5e-2), (
        float(jnp.max(jnp.abs(out - ref))))

    print("KERNEL_OK")
</pallas_src>

<mosaic_0001>
module attributes {stable_mosaic.version = 11 : i64} {
  func.func @_support_kernel(%arg0: i32, %arg1: memref<512x64xf32, #tpu.memory_space<vmem>>, %arg2: memref<64x128xf32, #tpu.memory_space<vmem>>, %arg3: memref<512x128xbf16, #tpu.memory_space<vmem>>) attributes {dimension_semantics = [#tpu.dimension_semantics<parallel>], iteration_bounds = array<i64: 1>, scalar_prefetch = 0 : i64, scratch_operands = 0 : i64, tpu.core_type = #tpu.core_type<tc>, window_params = [{transform_indices = @transform_0, window_bounds = array<i64: 512, 64>}, {pipeline_mode = #tpu.pipeline_mode<synchronous>, transform_indices = @transform_1, window_bounds = array<i64: 64, 128>}, {transform_indices = @transform_2, window_bounds = array<i64: 512, 128>}]} {
    %c0 = arith.constant 0 : index
    %c0_0 = arith.constant 0 : index
    %0 = vector.load %arg1[%c0, %c0_0] : memref<512x64xf32, #tpu.memory_space<vmem>>, vector<512x64xf32>
    %1 = arith.truncf %0 : vector<512x64xf32> to vector<512x64xbf16>
    %c0_1 = arith.constant 0 : index
    %c0_2 = arith.constant 0 : index
    %2 = vector.load %arg2[%c0_1, %c0_2] : memref<64x128xf32, #tpu.memory_space<vmem>>, vector<64x128xf32>
    %3 = arith.truncf %2 : vector<64x128xf32> to vector<64x128xbf16>
    %cst = arith.constant dense<0.000000e+00> : vector<512x128xf32>
    %4 = tpu.matmul %1, %3, %cst {dimension_numbers = #tpu.dot_dimension_numbers<[1], [0], [0], [1], [0, 0, 1, 1], [], []>} : vector<512x64xbf16>, vector<64x128xbf16>, vector<512x128xf32> -> vector<512x128xf32>
    %5 = arith.truncf %4 : vector<512x128xf32> to vector<512x128xbf16>
    %c0_3 = arith.constant 0 : index
    %c0_4 = arith.constant 0 : index
    %6 = vector.load %arg3[%c0_3, %c0_4] : memref<512x128xbf16, #tpu.memory_space<vmem>>, vector<512x128xbf16>
    tpu.vector_store %arg3[%c0_3, %c0_4], %5 {strides = array<i32>} : memref<512x128xbf16, #tpu.memory_space<vmem>>, vector<512x128xbf16>,
    return
  }
  func.func @transform_0(%arg0: i32) -> (i32, i32) {
    %c0_i32 = arith.constant 0 : i32
    %c0_i32_0 = arith.constant 0 : i32
    return %arg0, %c0_i32 : i32, i32
  }
  func.func @transform_1(%arg0: i32) -> (i32, i32) {
    %c0_i32 = arith.constant 0 : i32
    %c0_i32_0 = arith.constant 0 : i32
    %c0_i32_1 = arith.constant 0 : i32
    return %c0_i32, %c0_i32_0 : i32, i32
  }
  func.func @transform_2(%arg0: i32) -> (i32, i32) {
    %c0_i32 = arith.constant 0 : i32
    %c0_i32_0 = arith.constant 0 : i32
    return %arg0, %c0_i32 : i32, i32
  }
}

</mosaic_0001>

<bundles_post_ra>
// kernel: tpu_custom_call.1
= control target key start
LH: loop header
LB: loop body
LE: loop exit
PB: predicated region body
PF: predicated region fallthrough
CT: control target
= control target key end

     0   :  { %vm121_vm0 = vcmask 523264   ;;  %s1615_s0 = inlined_call_operand.vmem [shape: f32[512,64], index: 0, kind: input, shape index: {}]   ;;  %s1616_s1 = inlined_call_operand.vmem [shape: f32[64,128], index: 1, kind: input, shape index: {}]   ;;  %s1617_s2 = inlined_call_operand.hbm [shape: bf16[512,128], index: 2, kind: output, shape index: {}]  }
   0x1   :  { %v109_v0 = vld [vmem:[%s1616_s1] sm:$0xff]  ;;  %v110_v1 = vld [vmem:[%s1616_s1 + $0x8] sm:$0xff]  ;;  %v111_v2 = vld [vmem:[%s1616_s1 + $0x10] sm:$0xff] }
   0x2   :  { %v117_v3 = vpack.c.bf16 %v110_v1, %v109_v0  ;;  %v112_v4 = vld [vmem:[%s1616_s1 + $0x18] sm:$0xff]  ;;  %v113_v6 = vld [vmem:[%s1616_s1 + $0x20] sm:$0xff]  ;;  %v114_v7 = vld [vmem:[%s1616_s1 + $0x28] sm:$0xff] }
   0x3   :  { %v118_v5 = vpack.c.bf16 %v112_v4, %v111_v2  ;;  %v13_v8 = vld [vmem:[%s1615_s0] sm:$0xff]  ;;  %v14_v9 = vld [vmem:[%s1615_s0 + $0x8] sm:$0xff]  ;;  %v119_v14 = vpack.c.bf16 %v114_v7, %v113_v6  ;;  %v115_v15 = vld [vmem:[%s1616_s1 + $0x30] sm:$0xff] }
   0x4   :  { %1230 = vmatprep.subr.bf16.mxu0 %v117_v3  ;;  %1302 = vmatprep.subr.bf16.mxu1 %v117_v3  ;;  %v45_v10 = vld [vmem:[%s1615_s0 + $0x100] sm:$0xff]  ;;  %v46_v11 = vld [vmem:[%s1615_s0 + $0x108] sm:$0xff]  ;;  %v77_v12 = vpack.c.bf16 %v14_v9, %v13_v8  ;;  %v116_v16 = vld [vmem:[%s1616_s1 + $0x38] sm:$0xff] }
   0x5   :  { %1231 = vmatpush3.bf16.msra.mxu0 %v117_v3  ;;  %1306 = vmatpush3.bf16.msra.mxu1 %v117_v3  ;;  %v93_v13 = vpack.c.bf16 %v46_v11, %v45_v10  ;;  %v120_v17 = vpack.c.bf16 %v116_v16, %v115_v15  ;;  %v15_v18 = vld [vmem:[%s1615_s0 + $0x10] sm:$0xff]  ;;  %v16_v19 = vld [vmem:[%s1615_s0 + $0x18] sm:$0xff]  ;;  %v17_v22 = vld [vmem:[%s1615_s0 + $0x20] sm:$0xff] }
   0x6   :  { %1232 = vmatprep.subr.bf16.mxu0 %v118_v5  ;;  %1303 = vmatprep.subr.bf16.mxu1 %v118_v5  ;;  %v47_v20 = vld [vmem:[%s1615_s0 + $0x110] sm:$0xff]  ;;  %v48_v21 = vld [vmem:[%s1615_s0 + $0x118] sm:$0xff]  ;;  %v18_v23 = vld [vmem:[%s1615_s0 + $0x28] sm:$0xff]  ;;  %v78_v26 = vpack.c.bf16 %v16_v19, %v15_v18 }
   0x7   :  { %1238 = vmatprep.mubr.msk.bf16.mxu0 %vm121_vm0, %v77_v12  ;;  %1270 = vmatprep.mubr.msk.bf16.mxu1 %vm121_vm0, %v93_v13  ;;  %v49_v24 = vld [vmem:[%s1615_s0 + $0x120] sm:$0xff]  ;;  %v50_v25 = vld [vmem:[%s1615_s0 + $0x128] sm:$0xff]  ;;  %v94_v27 = vpack.c.bf16 %v48_v21, %v47_v20  ;;  %v79_v28 = vpack.c.bf16 %v18_v23, %v17_v22  ;;  %v19_v30 = vld [vmem:[%s1615_s0 + $0x30] sm:$0xff] }
   0x8   :  { %v95_v29 = vpack.c.bf16 %v50_v25, %v49_v24  ;;  %v20_v31 = vld [vmem:[%s1615_s0 + $0x38] sm:$0xff]  ;;  %v51_v32 = vld [vmem:[%s1615_s0 + $0x130] sm:$0xff]  ;;  %v21_v34 = vld [vmem:[%s1615_s0 + $0x40] sm:$0xff] }
   0x9   :  { %1233 = vmatpush3.bf16.msra.mxu0 %v118_v5  ;;  %1307 = vmatpush3.bf16.msra.mxu1 %v118_v5  ;;  %v52_v33 = vld [vmem:[%s1615_s0 + $0x138] sm:$0xff]  ;;  %v22_v35 = vld [vmem:[%s1615_s0 + $0x48] sm:$0xff]  ;;  %v53_v36 = vld [vmem:[%s1615_s0 + $0x140] sm:$0xff]  ;;  %v80_v38 = vpack.c.bf16 %v20_v31, %v19_v30 }
   0xa   :  { %1234 = vmatprep.subr.bf16.mxu0 %v119_v14  ;;  %1304 = vmatprep.subr.bf16.mxu1 %v119_v14  ;;  %v54_v37 = vld [vmem:[%s1615_s0 + $0x148] sm:$0xff]  ;;  %v96_v39 = vpack.c.bf16 %v52_v33, %v51_v32  ;;  %v81_v40 = vpack.c.bf16 %v22_v35, %v21_v34 }
   0xb   :  { %v97_v41 = vpack.c.bf16 %v54_v37, %v53_v36 }
   0xd   :  { %1235 = vmatpush3.bf16.msra.mxu0 %v119_v14  ;;  %1308 = vmatpush3.bf16.msra.mxu1 %v119_v14 }
   0xe   :  { %1236 = vmatprep.subr.bf16.mxu0 %v120_v17  ;;  %1305 = vmatprep.subr.bf16.mxu1 %v120_v17 }
  0x11   :  { %1237 = vmatpush3.bf16.msra.mxu0 %v120_v17  ;;  %1309 = vmatpush3.bf16.msra.mxu1 %v120_v17 }
  0x14   :  { %1239 = vmatmul.mubr.msk.bf16.vlgmr.msra.gmra.mrb[0].mxu0 %vm121_vm0, %v78_v26  ;;  %1271 = vmatmul.mubr.msk.bf16.vlgmr.msra.gmra.mrb[0].mxu1 %vm121_vm0, %v94_v27 }
  0x15   :  { %1242 = vmatprep.mubr.msk.bf16.mxu0 %vm121_vm0, %v79_v28  ;;  %1274 = vmatprep.mubr.msk.bf16.mxu1 %vm121_vm0, %v95_v29 }
  0x16   :  { %7 = vsyncpa [#allocation3], 0  ;;  %v23_v42 = vld [vmem:[%s1615_s0 + $0x50] sm:$0xff]  ;;  %v24_v43 = vld [vmem:[%s1615_s0 + $0x58] sm:$0xff] }
  0x17   :  { %v55_v44 = vld [vmem:[%s1615_s0 + $0x150] sm:$0xff]  ;;  %v56_v45 = vld [vmem:[%s1615_s0 + $0x158] sm:$0xff]  ;;  %v25_v46 = vld [vmem:[%s1615_s0 + $0x60] sm:$0xff]  ;;  %v82_v50 = vpack.c.bf16 %v24_v43, %v23_v42 }
  0x18   :  { %v26_v47 = vld [vmem:[%s1615_s0 + $0x68] sm:$0xff]  ;;  %v57_v48 = vld [vmem:[%s1615_s0 + $0x160] sm:$0xff]  ;;  %v98_v51 = vpack.c.bf16 %v56_v45, %v55_v44  ;;  %v27_v54 = vld [vmem:[%s1615_s0 + $0x70] sm:$0xff] }
  0x19   :  { %v58_v49 = vld [vmem:[%s1615_s0 + $0x168] sm:$0xff]  ;;  %v83_v52 = vpack.c.bf16 %v26_v47, %v25_v46  ;;  %v28_v55 = vld [vmem:[%s1615_s0 + $0x78] sm:$0xff]  ;;  %v59_v56 = vld [vmem:[%s1615_s0 + $0x170] sm:$0xff] }
  0x1a   :  { %v99_v53 = vpack.c.bf16 %v58_v49, %v57_v48  ;;  %v60_v57 = vld [vmem:[%s1615_s0 + $0x178] sm:$0xff]  ;;  %v29_v58 = vld [vmem:[%s1615_s0 + $0x80] sm:$0xff]  ;;  %v30_v59 = vld [vmem:[%s1615_s0 + $0x88] sm:$0xff]  ;;  %v84_v62 = vpack.c.bf16 %v28_v55, %v27_v54 }
  0x1b   :  { %v61_v60 = vld [vmem:[%s1615_s0 + $0x180] sm:$0xff]  ;;  %v62_v61 = vld [vmem:[%s1615_s0 + $0x188] sm:$0xff]  ;;  %v100_v63 = vpack.c.bf16 %v60_v57, %v59_v56  ;;  %v85_v0 = vpack.c.bf16 %v30_v59, %v29_v58  ;;  %v31_v2 = vld [vmem:[%s1615_s0 + $0x90] sm:$0xff] }
  0x1c   :  { %1243 = vmatmul.mubr.msk.bf16.gmra.mrb[4].mxu0 %vm121_vm0, %v80_v38  ;;  %1275 = vmatmul.mubr.msk.bf16.gmra.mrb[4].mxu1 %vm121_vm0, %v96_v39  ;;  %v101_v1 = vpack.c.bf16 %v62_v61, %v61_v60  ;;  %v32_v3 = vld [vmem:[%s1615_s0 + $0x98] sm:$0xff]  ;;  %v63_v4 = vld [vmem:[%s1615_s0 + $0x190] sm:$0xff]  ;;  %v33_v6 = vld [vmem:[%s1615_s0 + $0xa0] sm:$0xff] }
  0x1d   :  { %1246 = vmatprep.mubr.msk.bf16.mxu0 %vm121_vm0, %v81_v40  ;;  %1278 = vmatprep.mubr.msk.bf16.mxu1 %vm121_vm0, %v97_v41  ;;  %v64_v5 = vld [vmem:[%s1615_s0 + $0x198] sm:$0xff]  ;;  %v34_v7 = vld [vmem:[%s1615_s0 + $0xa8] sm:$0xff]  ;;  %v65_v8 = vld [vmem:[%s1615_s0 + $0x1a0] sm:$0xff]  ;;  %v86_v10 = vpack.c.bf16 %v32_v3, %v31_v2 }
  0x1e   :  { %v66_v9 = vld [vmem:[%s1615_s0 + $0x1a8] sm:$0xff]  ;;  %v102_v11 = vpack.c.bf16 %v64_v5, %v63_v4  ;;  %v87_v12 = vpack.c.bf16 %v34_v7, %v33_v6  ;;  %v35_v14 = vld [vmem:[%s1615_s0 + $0xb0] sm:$0xff]  ;;  %v36_v15 = vld [vmem:[%s1615_s0 + $0xb8] sm:$0xff] }
  0x1f   :  { %v103_v13 = vpack.c.bf16 %v66_v9, %v65_v8  ;;  %v67_v16 = vld [vmem:[%s1615_s0 + $0x1b0] sm:$0xff]  ;;  %v68_v17 = vld [vmem:[%s1615_s0 + $0x1b8] sm:$0xff]  ;;  %v37_v18 = vld [vmem:[%s1615_s0 + $0xc0] sm:$0xff]  ;;  %v88_v22 = vpack.c.bf16 %v36_v15, %v35_v14 }
  0x20   :  { %v38_v19 = vld [vmem:[%s1615_s0 + $0xc8] sm:$0xff]  ;;  %v69_v20 = vld [vmem:[%s1615_s0 + $0x1c0] sm:$0xff]  ;;  %v104_v23 = vpack.c.bf16 %v68_v17, %v67_v16  ;;  %v39_v26 = vld [vmem:[%s1615_s0 + $0xd0] sm:$0xff] }
  0x21   :  { %v70_v21 = vld [vmem:[%s1615_s0 + $0x1c8] sm:$0xff]  ;;  %v89_v24 = vpack.c.bf16 %v38_v19, %v37_v18  ;;  %v40_v27 = vld [vmem:[%s1615_s0 + $0xd8] sm:$0xff]  ;;  %v71_v28 = vld [vmem:[%s1615_s0 + $0x1d0] sm:$0xff] }
  0x22   :  { %v105_v25 = vpack.c.bf16 %v70_v21, %v69_v20  ;;  %v72_v29 = vld [vmem:[%s1615_s0 + $0x1d8] sm:$0xff]  ;;  %v41_v30 = vld [vmem:[%s1615_s0 + $0xe0] sm:$0xff]  ;;  %v42_v31 = vld [vmem:[%s1615_s0 + $0xe8] sm:$0xff]  ;;  %v90_v34 = vpack.c.bf16 %v40_v27, %v39_v26 }
  0x23   :  { %v73_v32 = vld [vmem:[%s1615_s0 + $0x1e0] sm:$0xff]  ;;  %v74_v33 = vld [vmem:[%s1615_s0 + $0x1e8] sm:$0xff]  ;;  %v106_v35 = vpack.c.bf16 %v72_v29, %v71_v28  ;;  %v91_v36 = vpack.c.bf16 %v42_v31, %v41_v30  ;;  %v43_v38 = vld [vmem:[%s1615_s0 + $0xf0] sm:$0xff] }
  0x24   :  { %1247 = vmatmul.mubr.msk.bf16.gmra.mrb[8].mxu0 %vm121_vm0, %v82_v50  ;;  %1279 = vmatmul.mubr.msk.bf16.gmra.mrb[8].mxu1 %vm121_vm0, %v98_v51  ;;  %v107_v37 = vpack.c.bf16 %v74_v33, %v73_v32  ;;  %v44_v39 = vld [vmem:[%s1615_s0 + $0xf8] sm:$0xff]  ;;  %v75_v40 = vld [vmem:[%s1615_s0 + $0x1f0] sm:$0xff] }
  0x25   :  { %1250 = vmatprep.mubr.msk.bf16.mxu0 %vm121_vm0, %v83_v52  ;;  %1282 = vmatprep.mubr.msk.bf16.mxu1 %vm121_vm0, %v99_v53  ;;  %v76_v41 = vld [vmem:[%s1615_s0 + $0x1f8] sm:$0xff]  ;;  %v92_v42 = vpack.c.bf16 %v44_v39, %v43_v38  ;;  %s1337_s0 = smov [#allocation2]  }
  0x26   :  { %v108_v43 = vpack.c.bf16 %v76_v41, %v75_v40  ;;  %s832_s1 = sshll.u32 %s1337_s0, 4  ;;  %s833_s1 = int_to_ptr.vmem [resolvable:$true] %s832_s1 }
  0x27   :  { %s1313_s9 = scalar_lea.vmem %s833_s1, 4096  ;;  %p1318_p1 = scmp.lt.s32.totalorder %s833_s1, %s833_s1 }
  0x28   :  { %p1314_p0 = scmp.ne.s32.totalorder %s833_s1, %s1313_s9  ;;  %p1319_p2 = scmp.lt.s32.totalorder %s1313_s9, %s1313_s9 }
  0x2a   :  { %p1320_p3 = por %p1319_p2, %p1318_p1 }
  0x2c   :  { %1251 = vmatmul.mubr.msk.bf16.gmra.mrb[12].mxu0 %vm121_vm0, %v84_v62  ;;  %1283 = vmatmul.mubr.msk.bf16.gmra.mrb[12].mxu1 %vm121_vm0, %v100_v63  ;;  %p1321_p4 = pnand %p1320_p3, %p1314_p0 }
  0x2d   :  { %1254 = vmatprep.mubr.msk.bf16.mxu0 %vm121_vm0, %v85_v0  ;;  %1286 = vmatprep.mubr.msk.bf16.mxu1 %vm121_vm0, %v101_v1 }
  0x34   :  { %1255 = vmatmul.mubr.msk.bf16.gmra.mrb[16].mxu0 %vm121_vm0, %v86_v10  ;;  %1287 = vmatmul.mubr.msk.bf16.gmra.mrb[16].mxu1 %vm121_vm0, %v102_v11 }
  0x35   :  { %1258 = vmatprep.mubr.msk.bf16.mxu0 %vm121_vm0, %v87_v12  ;;  %1290 = vmatprep.mubr.msk.bf16.mxu1 %vm121_vm0, %v103_v13 }
  0x3c   :  { %1259 = vmatmul.mubr.msk.bf16.gmra.mrb[20].mxu0 %vm121_vm0, %v88_v22  ;;  %1291 = vmatmul.mubr.msk.bf16.gmra.mrb[20].mxu1 %vm121_vm0, %v104_v23 }
  0x3d   :  { %1262 = vmatprep.mubr.msk.bf16.mxu0 %vm121_vm0, %v89_v24  ;;  %1294 = vmatprep.mubr.msk.bf16.mxu1 %vm121_vm0, %v105_v25 }
  0x44   :  { %1263 = vmatmul.mubr.msk.bf16.gmra.mrb[24].mxu0 %vm121_vm0, %v90_v34  ;;  %1295 = vmatmul.mubr.msk.bf16.gmra.mrb[24].mxu1 %vm121_vm0, %v106_v35 }
  0x45   :  { %1266 = vmatprep.mubr.msk.bf16.mxu0 %vm121_vm0, %v91_v36  ;;  %1298 = vmatprep.mubr.msk.bf16.mxu1 %vm121_vm0, %v107_v37 }
  0x4c   :  { %1267 = vmatmul.mubr.msk.bf16.gmra.mrb[28].mxu0 %vm121_vm0, %v92_v42  ;;  %1299 = vmatmul.mubr.msk.bf16.gmra.mrb[28].mxu1 %vm121_vm0, %v108_v43 }
  0xe7   :  { %v1240_v44 = vpop.f32.mrb[0].mxu0  ;;  %v1272_v45 = vpop.f32.mrb[0].mxu1 }
  0xe8   :  { %v252_v46 = vpop.f32.mrb[1].mxu0  ;;  %v380_v47 = vpop.f32.mrb[1].mxu1 }
  0xe9   :  { %v1241_v48 = vpop.f32.mrb[2].mxu0  ;;  %v1273_v49 = vpop.f32.mrb[2].mxu1 }
  0xea   :  { %v1011_v50 = vpack.c.bf16 %v1241_v48, %v1240_v44  ;;  %v1091_v51 = vpack.c.bf16 %v1273_v49, %v1272_v45  ;;  %v255_v52 = vpop.f32.mrb[3].mxu0  ;;  %v383_v53 = vpop.f32.mrb[3].mxu1 }
  0xeb   :  { %v1006_v54 = vpack.c.bf16 %v255_v52, %v252_v46  ;;  %v1086_v55 = vpack.c.bf16 %v383_v53, %v380_v47 }
  0xec   :  { %1163 = vst [vmem:[#allocation2 + $0x8] sm:$0xff] %v1011_v50   ;;  %1179 = vst [vmem:[#allocation2 + $0x88] sm:$0xff] %v1091_v51  }
  0xed   :  { %1007 = vst [vmem:[#allocation2] sm:$0xff] %v1006_v54   ;;  %1178 = vst [vmem:[#allocation2 + $0x80] sm:$0xff] %v1086_v55  }
  0xef   :  { %v1244_v56 = vpop.f32.mrb[4].mxu0  ;;  %v1276_v57 = vpop.f32.mrb[4].mxu1 }
  0xf0   :  { %v268_v58 = vpop.f32.mrb[5].mxu0  ;;  %v396_v59 = vpop.f32.mrb[5].mxu1 }
  0xf1   :  { %v1245_v60 = vpop.f32.mrb[6].mxu0  ;;  %v1277_v61 = vpop.f32.mrb[6].mxu1 }
  0xf2   :  { %v1021_v62 = vpack.c.bf16 %v1245_v60, %v1244_v56  ;;  %v1101_v63 = vpack.c.bf16 %v1277_v61, %v1276_v57  ;;  %v271_v0 = vpop.f32.mrb[7].mxu0  ;;  %v399_v1 = vpop.f32.mrb[7].mxu1 }
  0xf3   :  { %v1016_v2 = vpack.c.bf16 %v271_v0, %v268_v58  ;;  %v1096_v3 = vpack.c.bf16 %v399_v1, %v396_v59 }
  0xf4   :  { %1165 = vst [vmem:[#allocation2 + $0x18] sm:$0xff] %v1021_v62   ;;  %1181 = vst [vmem:[#allocation2 + $0x98] sm:$0xff] %v1101_v63  }
  0xf5   :  { %1164 = vst [vmem:[#allocation2 + $0x10] sm:$0xff] %v1016_v2   ;;  %1180 = vst [vmem:[#allocation2 + $0x90] sm:$0xff] %v1096_v3  }
  0xf7   :  { %v1248_v4 = vpop.f32.mrb[8].mxu0  ;;  %v1280_v5 = vpop.f32.mrb[8].mxu1 }
  0xf8   :  { %v284_v6 = vpop.f32.mrb[9].mxu0  ;;  %v412_v7 = vpop.f32.mrb[9].mxu1 }
  0xf9   :  { %v1249_v8 = vpop.f32.mrb[10].mxu0  ;;  %v1281_v9 = vpop.f32.mrb[10].mxu1 }
  0xfa   :  { %v1031_v10 = vpack.c.bf16 %v1249_v8, %v1248_v4  ;;  %v1111_v11 = vpack.c.bf16 %v1281_v9, %v1280_v5  ;;  %v287_v12 = vpop.f32.mrb[11].mxu0  ;;  %v415_v13 = vpop.f32.mrb[11].mxu1 }
  0xfb   :  { %v1026_v14 = vpack.c.bf16 %v287_v12, %v284_v6  ;;  %v1106_v15 = vpack.c.bf16 %v415_v13, %v412_v7 }
  0xfc   :  { %1167 = vst [vmem:[#allocation2 + $0x28] sm:$0xff] %v1031_v10   ;;  %1183 = vst [vmem:[#allocation2 + $0xa8] sm:$0xff] %v1111_v11  }
  0xfd   :  { %1166 = vst [vmem:[#allocation2 + $0x20] sm:$0xff] %v1026_v14   ;;  %1182 = vst [vmem:[#allocation2 + $0xa0] sm:$0xff] %v1106_v15  }
  0xff   :  { %v1252_v16 = vpop.f32.mrb[12].mxu0  ;;  %v1284_v17 = vpop.f32.mrb[12].mxu1 }
 0x100   :  { %v300_v18 = vpop.f32.mrb[13].mxu0  ;;  %v428_v19 = vpop.f32.mrb[13].mxu1 }
 0x101   :  { %v1253_v20 = vpop.f32.mrb[14].mxu0  ;;  %v1285_v21 = vpop.f32.mrb[14].mxu1 }
 0x102   :  { %v1041_v22 = vpack.c.bf16 %v1253_v20, %v1252_v16  ;;  %v1121_v23 = vpack.c.bf16 %v1285_v21, %v1284_v17  ;;  %v303_v24 = vpop.f32.mrb[15].mxu0  ;;  %v431_v25 = vpop.f32.mrb[15].mxu1 }
 0x103   :  { %v1036_v26 = vpack.c.bf16 %v303_v24, %v300_v18  ;;  %v1116_v27 = vpack.c.bf16 %v431_v25, %v428_v19 }
 0x104   :  { %1169 = vst [vmem:[#allocation2 + $0x38] sm:$0xff] %v1041_v22   ;;  %1185 = vst [vmem:[#allocation2 + $0xb8] sm:$0xff] %v1121_v23  }
 0x105   :  { %1168 = vst [vmem:[#allocation2 + $0x30] sm:$0xff] %v1036_v26   ;;  %1184 = vst [vmem:[#allocation2 + $0xb0] sm:$0xff] %v1116_v27  }
 0x107   :  { %v1256_v28 = vpop.f32.mrb[16].mxu0  ;;  %v1288_v29 = vpop.f32.mrb[16].mxu1 }
 0x108   :  { %v316_v30 = vpop.f32.mrb[17].mxu0  ;;  %v444_v31 = vpop.f32.mrb[17].mxu1 }
 0x109   :  { %v1257_v32 = vpop.f32.mrb[18].mxu0  ;;  %v1289_v33 = vpop.f32.mrb[18].mxu1 }
 0x10a   :  { %v1051_v34 = vpack.c.bf16 %v1257_v32, %v1256_v28  ;;  %v1131_v35 = vpack.c.bf16 %v1289_v33, %v1288_v29  ;;  %v319_v36 = vpop.f32.mrb[19].mxu0  ;;  %v447_v37 = vpop.f32.mrb[19].mxu1 }
 0x10b   :  { %v1046_v38 = vpack.c.bf16 %v319_v36, %v316_v30  ;;  %v1126_v39 = vpack.c.bf16 %v447_v37, %v444_v31 }
 0x10c   :  { %1171 = vst [vmem:[#allocation2 + $0x48] sm:$0xff] %v1051_v34   ;;  %1187 = vst [vmem:[#allocation2 + $0xc8] sm:$0xff] %v1131_v35  }
 0x10d   :  { %1170 = vst [vmem:[#allocation2 + $0x40] sm:$0xff] %v1046_v38   ;;  %1186 = vst [vmem:[#allocation2 + $0xc0] sm:$0xff] %v1126_v39  }
 0x10f   :  { %v1260_v40 = vpop.f32.mrb[20].mxu0  ;;  %v1292_v41 = vpop.f32.mrb[20].mxu1 }
 0x110   :  { %v332_v42 = vpop.f32.mrb[21].mxu0  ;;  %v460_v43 = vpop.f32.mrb[21].mxu1 }
 0x111   :  { %v1261_v44 = vpop.f32.mrb[22].mxu0  ;;  %v1293_v45 = vpop.f32.mrb[22].mxu1 }
 0x112   :  { %v1061_v46 = vpack.c.bf16 %v1261_v44, %v1260_v40  ;;  %v1141_v47 = vpack.c.bf16 %v1293_v45, %v1292_v41  ;;  %v335_v48 = vpop.f32.mrb[23].mxu0  ;;  %v463_v49 = vpop.f32.mrb[23].mxu1 }
 0x113   :  { %v1056_v50 = vpack.c.bf16 %v335_v48, %v332_v42  ;;  %v1136_v51 = vpack.c.bf16 %v463_v49, %v460_v43 }
 0x114   :  { %1173 = vst [vmem:[#allocation2 + $0x58] sm:$0xff] %v1061_v46   ;;  %1189 = vst [vmem:[#allocation2 + $0xd8] sm:$0xff] %v1141_v47  }
 0x115   :  { %1172 = vst [vmem:[#allocation2 + $0x50] sm:$0xff] %v1056_v50   ;;  %1188 = vst [vmem:[#allocation2 + $0xd0] sm:$0xff] %v1136_v51  }
 0x117   :  { %v1264_v52 = vpop.f32.mrb[24].mxu0  ;;  %v1296_v53 = vpop.f32.mrb[24].mxu1 }
 0x118   :  { %v348_v54 = vpop.f32.mrb[25].mxu0  ;;  %v476_v55 = vpop.f32.mrb[25].mxu1 }
 0x119   :  { %v1265_v56 = vpop.f32.mrb[26].mxu0  ;;  %v1297_v57 = vpop.f32.mrb[26].mxu1 }
 0x11a   :  { %v1071_v58 = vpack.c.bf16 %v1265_v56, %v1264_v52  ;;  %v1151_v59 = vpack.c.bf16 %v1297_v57, %v1296_v53  ;;  %v351_v60 = vpop.f32.mrb[27].mxu0  ;;  %v479_v61 = vpop.f32.mrb[27].mxu1 }
 0x11b   :  { %v1066_v62 = vpack.c.bf16 %v351_v60, %v348_v54  ;;  %v1146_v63 = vpack.c.bf16 %v479_v61, %v476_v55 }
 0x11c   :  { %1175 = vst [vmem:[#allocation2 + $0x68] sm:$0xff] %v1071_v58   ;;  %1191 = vst [vmem:[#allocation2 + $0xe8] sm:$0xff] %v1151_v59  }
 0x11d   :  { %1174 = vst [vmem:[#allocation2 + $0x60] sm:$0xff] %v1066_v62   ;;  %1190 = vst [vmem:[#allocation2 + $0xe0] sm:$0xff] %v1146_v63  }
 0x11f   :  { %v1268_v0 = vpop.f32.mrb[28].mxu0  ;;  %v1300_v1 = vpop.f32.mrb[28].mxu1 }
 0x120   :  { %v364_v2 = vpop.f32.mrb[29].mxu0  ;;  %v492_v3 = vpop.f32.mrb[29].mxu1 }
 0x121   :  { %v1269_v4 = vpop.f32.mrb[30].mxu0  ;;  %v1301_v5 = vpop.f32.mrb[30].mxu1 }
 0x122   :  { %v1081_v6 = vpack.c.bf16 %v1269_v4, %v1268_v0  ;;  %v1161_v7 = vpack.c.bf16 %v1301_v5, %v1300_v1  ;;  %v367_v8 = vpop.f32.mrb[31].mxu0  ;;  %v495_v9 = vpop.f32.mrb[31].mxu1 }
 0x123   :  { %v1076_v10 = vpack.c.bf16 %v367_v8, %v364_v2  ;;  %v1156_v11 = vpack.c.bf16 %v495_v9, %v492_v3 }
 0x124   :  { %1177 = vst [vmem:[#allocation2 + $0x78] sm:$0xff] %v1081_v6   ;;  %1193 = vst [vmem:[#allocation2 + $0xf8] sm:$0xff] %v1161_v7  }
 0x125   :  { %1176 = vst [vmem:[#allocation2 + $0x70] sm:$0xff] %v1076_v10   ;;  %1192 = vst [vmem:[#allocation2 + $0xf0] sm:$0xff] %v1156_v11  }
 0x126   :  { %1324 = shalt.err (!%p1321_p4)
}
 0x127   :  { %s1325_s12 = scalar_lea.hbm %s1617_s2, 4096 }
 0x128   :  { %p1326_p5 = scmp.ne.s32.totalorder %s1617_s2, %s1325_s12  ;;  %p1329_p6 = scmp.lt.u32.totalorder %s1325_s12, %s1617_s2 }
 0x12a   :  { %p1331_p7 = pnand %p1329_p6, %p1326_p5 }
 0x12c   :  { %1334 = shalt.err (!%p1331_p7)
}
 0x12d   :  { %s1338_s17 = smov 64   ;;  %s1339_s18 = smov 4  }
 0x12e   :  { %838 = dma.vmem_to_hbm [thread:$0]  %s833_s1, 4096, %s1617_s2, [#allocation3], %s1338_s17, %s1338_s17, %s1339_s18  }
 0x12f   :  { %1335 = dma.done.wait [#allocation3], 4096  }
 0x130   :  { %1336 = vsyncadd [#allocation3], 4294963200 }
 0x131   :  { %842 = vsyncpa [#allocation3], 1 }

</bundles_post_ra>
